<compile_context>
chip_gen: v7x
topology: tpu7x:2x2x1
jax: 0.10.0
libtpu: 0.0.40
codegen_flags: <defaults>
</compile_context>

<pallas_src>
import functools

import jax
import jax.numpy as jnp
from jax.experimental import pallas as pl
from jax.experimental.pallas import tpu as pltpu


@functools.lru_cache(maxsize=None)
def _bilinear_weight_matrix_t(in_size: int, out_size: int, dtype=jnp.float32):
    """Transposed interpolation matrix W^T (in_size, out_size) matching
    PyTorch bilinear resize with align_corners=False (antialias=False)."""
    scale = in_size / out_size
    d = jnp.arange(out_size, dtype=jnp.float32)
    src = scale * (d + 0.5) - 0.5
    src = jnp.maximum(src, 0.0)                      # PyTorch clamps negatives to 0
    i0 = jnp.floor(src).astype(jnp.int32)
    i0 = jnp.minimum(i0, in_size - 1)
    i1 = jnp.minimum(i0 + 1, in_size - 1)
    l1 = src - i0.astype(jnp.float32)
    l0 = 1.0 - l1
    oh0 = jax.nn.one_hot(i0, in_size, dtype=jnp.float32)
    oh1 = jax.nn.one_hot(i1, in_size, dtype=jnp.float32)
    w = l0[:, None] * oh0 + l1[:, None] * oh1        # (out_size, in_size), rows sum to 1
    return jnp.asarray(w.T, dtype=dtype)             # (in_size, out_size)


def _upsample_kernel(wht_ref, wwt_ref, x_ref, o_ref):
    # wht_ref: (H_in, H_out)    wwt_ref: (W_in, W_out)
    # x_ref  : (TB, H_in, W_in) o_ref  : (TB, H_out, W_out)
    tb, h_in, w_in = x_ref.shape
    h_out = wht_ref.shape[1]
    w_out = wwt_ref.shape[1]

    x = x_ref[...]

    # Height pass: bring H_in to the minor (contraction) axis, one big matmul.
    xt = jnp.swapaxes(x, -1, -2).reshape(tb * w_in, h_in)                # (TB*W_in, H_in)
    t = jnp.dot(xt, wht_ref[...], preferred_element_type=jnp.float32)    # (TB*W_in, H_out)

    # Width pass: bring W_in to the minor (contraction) axis, one big matmul.
    t = jnp.swapaxes(t.reshape(tb, w_in, h_out), -1, -2)                 # (TB, H_out, W_in)
    t = t.reshape(tb * h_out, w_in).astype(wwt_ref.dtype)
    out = jnp.dot(t, wwt_ref[...], preferred_element_type=jnp.float32)   # (TB*H_out, W_out)

    o_ref[...] = out.reshape(tb, h_out, w_out).astype(o_ref.dtype)


def _pick_batch_tile(b, h_in, w_in, h_out, w_out, itemsize):
    """Images per grid step: fill VMEM (but stay under conservative scoped
    limits on all generations) and keep >= 2 grid steps for megacore/2-TC."""
    budget = 12 * 1024 * 1024
    per_image = (
        itemsize * (h_in * w_in + h_out * w_out)                   # pipelined in/out blocks
        + 4 * (h_in * w_in + 2 * w_in * h_out + h_out * w_out)     # f32 intermediates
    )
    tb = max(1, budget // (2 * per_image))
    tb = min(tb, b)
    if b >= 2:
        tb = min(tb, (b + 1) // 2)
    return int(tb)


def match_block(x: jnp.ndarray, image_size) -> jnp.ndarray:
    """Bilinear resize of NCHW `x` to spatial size `image_size`
    (align_corners=False), matching MatchBlock.forward."""
    if isinstance(image_size, int):
        h_out, w_out = image_size, image_size
    else:
        h_out, w_out = image_size

    n, c, h_in, w_in = x.shape
    b = n * c
    xb = x.reshape(b, h_in, w_in)

    w_dtype = jnp.bfloat16 if x.dtype == jnp.bfloat16 else jnp.float32
    wht = _bilinear_weight_matrix_t(h_in, h_out, w_dtype)    # (H_in, H_out)
    wwt = _bilinear_weight_matrix_t(w_in, w_out, w_dtype)    # (W_in, W_out)

    tb = _pick_batch_tile(b, h_in, w_in, h_out, w_out, jnp.dtype(x.dtype).itemsize)
    grid = (pl.cdiv(b, tb),)

    out = pl.pallas_call(
        _upsample_kernel,
        out_shape=jax.ShapeDtypeStruct((b, h_out, w_out), x.dtype),
        grid_spec=pltpu.PrefetchScalarGridSpec(
            num_scalar_prefetch=0,
            grid=grid,
            in_specs=[
                pl.BlockSpec((h_in, h_out), lambda i: (0, 0)),        # Wh^T, resident
                pl.BlockSpec((w_in, w_out), lambda i: (0, 0)),        # Ww^T, resident
                pl.BlockSpec((tb, h_in, w_in), lambda i: (i, 0, 0)),  # TB images / step
            ],
            out_specs=pl.BlockSpec((tb, h_out, w_out), lambda i: (i, 0, 0)),
        ),
        compiler_params=pltpu.CompilerParams(
            dimension_semantics=("parallel",),
            vmem_limit_bytes=32 * 1024 * 1024,
        ),
    )(wht, wwt, xb)

    return out.reshape(n, c, h_out, w_out)


def _reference(x, image_size):
    """Pure-JAX reference (same separable formulation) for a sanity check."""
    if isinstance(image_size, int):
        h_out, w_out = image_size, image_size
    else:
        h_out, w_out = image_size
    n, c, h_in, w_in = x.shape
    wh = _bilinear_weight_matrix_t(h_in, h_out, jnp.float32).T   # (H_out, H_in)
    ww = _bilinear_weight_matrix_t(w_in, w_out, jnp.float32).T   # (W_out, W_in)
    return jnp.einsum('ph,nchw,qw->ncpq', wh, x.astype(jnp.float32), ww).astype(x.dtype)


if __name__ == "__main__":
    key = jax.random.PRNGKey(0)
    # small input: N=2, C=4, H=W=16, upsample to image_size=(32, 32)
    x = jax.random.normal(key, (2, 4, 16, 16), dtype=jnp.float32)
    image_size = (32, 32)

    out = match_block(x, image_size)
    out = jax.block_until_ready(out)

    ref = _reference(x, image_size)
    assert out.shape == (2, 4, 32, 32), out.shape
    assert jnp.allclose(out, ref, atol=1e-5, rtol=1e-5), "mismatch vs reference"

    print("KERNEL_OK")
</pallas_src>

<mosaic_0001>
module attributes {stable_mosaic.version = 11 : i64} {
  func.func @_upsample_kernel(%arg0: i32, %arg1: memref<16x32xf32, #tpu.memory_space<vmem>>, %arg2: memref<16x32xf32, #tpu.memory_space<vmem>>, %arg3: memref<4x16x16xf32, #tpu.memory_space<vmem>>, %arg4: memref<4x32x32xf32, #tpu.memory_space<vmem>>) attributes {dimension_semantics = [#tpu.dimension_semantics<parallel>], iteration_bounds = array<i64: 2>, scalar_prefetch = 0 : i64, scratch_operands = 0 : i64, tpu.core_type = #tpu.core_type<tc>, window_params = [{pipeline_mode = #tpu.pipeline_mode<synchronous>, transform_indices = @transform_0, window_bounds = array<i64: 16, 32>}, {pipeline_mode = #tpu.pipeline_mode<synchronous>, transform_indices = @transform_1, window_bounds = array<i64: 16, 32>}, {transform_indices = @transform_2, window_bounds = array<i64: 4, 16, 16>}, {transform_indices = @transform_3, window_bounds = array<i64: 4, 32, 32>}]} {
    %c0 = arith.constant 0 : index
    %c0_0 = arith.constant 0 : index
    %c0_1 = arith.constant 0 : index
    %0 = vector.load %arg3[%c0, %c0_0, %c0_1] : memref<4x16x16xf32, #tpu.memory_space<vmem>>, vector<4x16x16xf32>
    %1 = tpu.transpose %0, [0, 2, 1] : vector<4x16x16xf32> -> vector<4x16x16xf32>
    %2 = vector.shape_cast %1 : vector<4x16x16xf32> to vector<64x16xf32>
    %c0_2 = arith.constant 0 : index
    %c0_3 = arith.constant 0 : index
    %3 = vector.load %arg1[%c0_2, %c0_3] : memref<16x32xf32, #tpu.memory_space<vmem>>, vector<16x32xf32>
    %cst = arith.constant dense<0.000000e+00> : vector<64x32xf32>
    %4 = tpu.matmul %2, %3, %cst {dimension_numbers = #tpu.dot_dimension_numbers<[1], [0], [0], [1], [0, 0, 1, 1], [], []>} : vector<64x16xf32>, vector<16x32xf32>, vector<64x32xf32> -> vector<64x32xf32>
    %5 = vector.shape_cast %4 : vector<64x32xf32> to vector<4x16x32xf32>
    %6 = tpu.transpose %5, [0, 2, 1] : vector<4x16x32xf32> -> vector<4x32x16xf32>
    %7 = vector.shape_cast %6 : vector<4x32x16xf32> to vector<128x16xf32>
    %c0_4 = arith.constant 0 : index
    %c0_5 = arith.constant 0 : index
    %8 = vector.load %arg2[%c0_4, %c0_5] : memref<16x32xf32, #tpu.memory_space<vmem>>, vector<16x32xf32>
    %cst_6 = arith.constant dense<0.000000e+00> : vector<128x32xf32>
    %9 = tpu.matmul %7, %8, %cst_6 {dimension_numbers = #tpu.dot_dimension_numbers<[1], [0], [0], [1], [0, 0, 1, 1], [], []>} : vector<128x16xf32>, vector<16x32xf32>, vector<128x32xf32> -> vector<128x32xf32>
    %10 = vector.shape_cast %9 : vector<128x32xf32> to vector<4x32x32xf32>
    %c0_7 = arith.constant 0 : index
    %c0_8 = arith.constant 0 : index
    %c0_9 = arith.constant 0 : index
    %11 = vector.load %arg4[%c0_7, %c0_8, %c0_9] : memref<4x32x32xf32, #tpu.memory_space<vmem>>, vector<4x32x32xf32>
    tpu.vector_store %arg4[%c0_7, %c0_8, %c0_9], %10 {strides = array<i32>} : memref<4x32x32xf32, #tpu.memory_space<vmem>>, vector<4x32x32xf32>,
    return
  }
  func.func @transform_0(%arg0: i32) -> (i32, i32) {
    %c0_i32 = arith.constant 0 : i32
    %c0_i32_0 = arith.constant 0 : i32
    %c0_i32_1 = arith.constant 0 : i32
    return %c0_i32, %c0_i32_0 : i32, i32
  }
  func.func @transform_1(%arg0: i32) -> (i32, i32) {
    %c0_i32 = arith.constant 0 : i32
    %c0_i32_0 = arith.constant 0 : i32
    %c0_i32_1 = arith.constant 0 : i32
    return %c0_i32, %c0_i32_0 : i32, i32
  }
  func.func @transform_2(%arg0: i32) -> (i32, i32, i32) {
    %c0_i32 = arith.constant 0 : i32
    %c0_i32_0 = arith.constant 0 : i32
    %c0_i32_1 = arith.constant 0 : i32
    return %arg0, %c0_i32, %c0_i32_0 : i32, i32, i32
  }
  func.func @transform_3(%arg0: i32) -> (i32, i32, i32) {
    %c0_i32 = arith.constant 0 : i32
    %c0_i32_0 = arith.constant 0 : i32
    %c0_i32_1 = arith.constant 0 : i32
    return %arg0, %c0_i32, %c0_i32_0 : i32, i32, i32
  }
}

</mosaic_0001>

<bundles_post_ra>
// kernel: tpu_custom_call.1
= control target key start
LH: loop header
LB: loop body
LE: loop exit
PB: predicated region body
PF: predicated region fallthrough
CT: control target
= control target key end

     0   :  { %8 = vsyncpa [#allocation3], 0  ;;  %s1626_s0 = inlined_call_operand.hbm [shape: f32[16,32], index: 0, kind: input, shape index: {}]   ;;  %s1627_s1 = inlined_call_operand.hbm [shape: f32[16,32], index: 1, kind: input, shape index: {}]   ;;  %s1628_s2 = inlined_call_operand.hbm [shape: f32[8,16,16], index: 2, kind: input, shape index: {}]   ;;  %s1629_s3 = inlined_call_operand.hbm [shape: f32[8,32,32], index: 3, kind: output, shape index: {}]  }
   0x1   :  { %9 = vsyncpa [#allocation6], 0 }
   0x2   :  { %10 = vsyncpa [#allocation4], 0 }
   0x3   :  { %12 = vsyncpa [#allocation4 + $0x1], 0  ;;  %s1326_s12 = smov 0   ;;  %s1328_s13 = smov 0  }
   0x4   :  { %s1330_s14 = smov 0   ;;  %s1332_s15 = smov 0  }
   0x5 LB: > { %s1347_s16 = sadd.s32 4294967295, %s1296_s15   ;;  %s934_s17 = sadd.s32 4294967294, %s1296_s15   ;;  %s1296_s15 = sphi %s1332_s15, %s1657_s15   ;;  %s1292_s14 = sphi %s1330_s14, %s1656_s14   ;;  %s1288_s13 = sphi %s1328_s13, %s1655_s13   ;;  %s1284_s12 = sphi %s1326_s12, %s1654_s12  }
   0x6   : > { %s1351_s18 = sadd.s32 1, %s1296_s15   ;;  %s67_s19 = sadd.s32 1, %s1292_s14 }
   0x7   : > { %s64_s20 = ssub.s32 %s1296_s15, %s1351_s18  ;;  %p74_p0 = scmp.ne.s32.totalorder %s1292_s14, %s1288_s13 }
   0x8   : > { %p65_p1 = scmp.eq.s32.totalorder %s64_s20, 0  ;;  %p75_p2 = scmp.eq.s32.totalorder %s1296_s15, 0 }
   0x9   : > { %p80_p3 = scmp.ne.s32.totalorder %s1288_s13, %s1284_s12  ;;  %p1630_p4 = scmp.eq.s32.totalorder %s1347_s16, 0 }
   0xa   : > { %s1363_s21 = scalar_select %p65_p1, %s1292_s14, %s67_s19  }
   0xb   : > { %p1365_p5 = por %p75_p2, %p74_p0  ;;  %p1371_p6 = por %p1630_p4, %p80_p3 }
   0xc   : > { %p104_p7 = scmp.eq.s32.totalorder %s1347_s16, 1  ;;  %p110_p8 = scmp.eq.s32.totalorder %s934_s17, 1 }
   0xd   : > { %s1635_s22 = scalar_select %p1365_p5, 1, 0 }
   0xe   : > { %s1636_s23 = scalar_select %p1371_p6, 1, 0 }
   0xf   : > { %p935_p9 = scmp.ge.s32.totalorder %s1296_s15, 1  ;;  %p117_p10 = scmp.lt.s32.totalorder %s1296_s15, 3 }
  0x10   : > { %p1378_p11 = por %p104_p7, %p74_p0  ;;  %p1382_p12 = por %p110_p8, %p80_p3 }
  0x11   : > { %p1386_p13 = pnand %p935_p9, %p117_p10  ;;  %s1298_s27 = smov [#allocation2]  }
  0x12   : > { %s1637_s24 = scalar_select %p1378_p11, 1, 0 }
  0x13   : > { %s1638_s25 = scalar_select %p1382_p12, 1, 0 }
  0x14   : > { %s1639_s26 = scalar_select %p1386_p13, 1, 0 }
  0x15   : > { %p1076_p1 = pneg %p1386_p13  ;;  %s129_s28 = sshll.u32 %s1298_s27, 4  ;;  %s130_s28 = int_to_ptr.vmem [resolvable:$true] %s129_s28 }
  0x16   : > { %s1299_s30 = smov [#allocation5]   ;;  %s1136_s7 = scalar_lea.hbm %s1626_s0, 256 }
  0x17   : > { %p1394_p2 = pnand %p1076_p1, %p1630_p4  ;;  %s142_s4 = sshll.u32 %s1299_s30, 4  ;;  %s143_s4 = int_to_ptr.vmem [resolvable:$true] %s142_s4 }
  0x18   : > { %p1137_p7 = scmp.ne.s32.totalorder %s1626_s0, %s1136_s7  ;;  %p1143_p1 = scmp.lt.u32.totalorder %s1136_s7, %s1626_s0 }
  0x19   : > { %p1138_p8 = pneg %p1394_p2 }
  0x1b   : > { %p1139_p9 = pnand %p1138_p8, %p1137_p7 }
  0x1d   : > { %p1140_p10 = pneg %p1139_p9 }
  0x1f   : > { %p1145_p0 = pnand %p1143_p1, %p1140_p10 }
  0x21   : > { %1148 = shalt.err (!%p1145_p0)
}
  0x22   : > { %s1149_s17 = scalar_lea.vmem %s130_s28, 256  ;;  %p1157_p11 = scmp.lt.s32.totalorder %s130_s28, %s130_s28 }
  0x23   : > { %p1150_p4 = scmp.ne.s32.totalorder %s130_s28, %s1149_s17  ;;  %p1158_p6 = scmp.lt.s32.totalorder %s1149_s17, %s1149_s17 }
  0x25   : > { %p1152_p3 = pnand %p1150_p4, %p1138_p8  ;;  %p1159_p13 = por %p1158_p6, %p1157_p11 }
  0x27   : > { %p1153_p12 = pneg %p1152_p3 }
  0x29   : > { %p1160_p5 = pnand %p1159_p13, %p1153_p12 }
  0x2b   : > { %1163 = shalt.err (!%p1160_p5)
}
  0x2c   : > { %s1300_s19 = smov 128   ;;  %s1301_s20 = smov 8  }
  0x2d   : > { %1079 = dma.hbm_to_vmem [thread:$0]  (!%p1394_p2), %s1626_s0, 256, %s130_s28, [#allocation3], %s1300_s19, %s1300_s19, %s1301_s20  }
  0x2e   : > { %p1641_p4 = scmp.ne.s32.totalorder %s1635_s22, 0  ;;  %p1642_p0 = scmp.lt.s32.totalorder %s1296_s15, 2 }
  0x2f   : > { %s1164_s8 = scalar_lea.hbm %s1627_s1, 256 }
  0x30   : > { %p1429_p3 = pnand %p1642_p0, %p1641_p4  ;;  %p1165_p5 = scmp.ne.s32.totalorder %s1627_s1, %s1164_s8 }
  0x31   : > { %p1171_p12 = scmp.lt.u32.totalorder %s1164_s8, %s1627_s1 }
  0x32   : > { %s1643_s5 = scalar_select %p1429_p3, 1, 0 }
  0x33   : > { %p1167_p6 = pnand %p1165_p5, %p1138_p8 }
  0x35   : > { %p1168_p11 = pneg %p1167_p6 }
  0x37   : > { %p1173_p13 = pnand %p1171_p12, %p1168_p11 }
  0x39   : > { %1176 = shalt.err (!%p1173_p13)
}
  0x3a   : > { %s1177_s11 = scalar_lea.vmem %s143_s4, 256  ;;  %p1185_p1 = scmp.lt.s32.totalorder %s143_s4, %s143_s4 }
  0x3b   : > { %p1178_p7 = scmp.ne.s32.totalorder %s143_s4, %s1177_s11  ;;  %p1186_p4 = scmp.lt.s32.totalorder %s1177_s11, %s1177_s11 }
  0x3d   : > { %p1180_p9 = pnand %p1178_p7, %p1138_p8  ;;  %p1187_p0 = por %p1186_p4, %p1185_p1 }
  0x3f   : > { %p1181_p10 = pneg %p1180_p9 }
  0x41   : > { %p1188_p3 = pnand %p1187_p0, %p1181_p10 }
  0x43   : > { %1191 = shalt.err (!%p1188_p3)
}
  0x44   : > { %1082 = dma.hbm_to_vmem [thread:$0]  (!%p1394_p2), %s1627_s1, 256, %s143_s4, [#allocation6], %s1300_s19, %s1300_s19, %s1301_s20  }
  0x45   : > { %s156_s30 = sand.u32 1, %s1296_s15   ;;  %s158_s6 = sand.u32 1, %s1292_s14  }
  0x46   : > { %s939_s7 = sshll.u32 %s158_s6, 6  ;;  %s979_s8 = sshll.u32 %s1296_s15, 10 }
  0x47   : > { %s1462_s29 = scalar_lea.hbm %s1628_s2, %s979_s8  ;;  %s160_s28 = scalar_lea.vmem [#allocation7], %s939_s7 }
  0x48   : > { %s168_s22 = sshll.u32 %s160_s28, 4  ;;  %s1466_s11 = scalar_lea.sflag [#allocation3], %s156_s30  ;;  %s1464_s22 = int_to_ptr.vmem [resolvable:$true] %s168_s22 }
  0x49   : > { %s1192_s4 = scalar_lea.hbm %s1462_s29, 1024  ;;  %p1644_p8 = scmp.ne.s32.totalorder %s1643_s5, 0 }
  0x4a   : > { %p1193_p2 = scmp.ne.s32.totalorder %s1462_s29, %s1192_s4  ;;  %s1197_s6 = scalar_lea.hbm %s1628_s2, 2048 }
  0x4b   : > { %p1194_p3 = pneg %p1644_p8  ;;  %p1198_p11 = scmp.lt.u32.totalorder %s1462_s29, %s1628_s2 }
  0x4c   : > { %p1199_p12 = scmp.lt.u32.totalorder %s1197_s6, %s1192_s4  ;;  %p1201_p7 = scmp.lt.u32.totalorder %s1192_s4, %s1462_s29 }
  0x4d   : > { %p1195_p5 = pnand %p1194_p3, %p1193_p2 }
  0x4e   : > { %p1200_p13 = por %p1199_p12, %p1198_p11 }
  0x4f   : > { %p1196_p6 = pneg %p1195_p5 }
  0x50   : > { %p1202_p9 = por %p1201_p7, %p1200_p13 }
  0x52   : > { %p1203_p10 = pnand %p1202_p9, %p1196_p6 }
  0x54   : > { %1206 = shalt.err (!%p1203_p10)
}
  0x55   : > { %s1207_s30 = scalar_lea.vmem %s1464_s22, 1024  ;;  %s1302_s7 = smov [#allocation7]  }
  0x56   : > { %p1208_p1 = scmp.ne.s32.totalorder %s1464_s22, %s1207_s30  ;;  %s1212_s10 = sshll.u32 %s1302_s7, 4  ;;  %s1213_s10 = int_to_ptr.vmem [resolvable:$false] %s1212_s10 }
  0x57   : > { %s1214_s28 = scalar_lea.vmem %s1213_s10, 2048  ;;  %p1215_p2 = scmp.lt.s32.totalorder %s1464_s22, %s1213_s10 }
  0x58   : > { %p1210_p4 = pnand %p1208_p1, %p1194_p3  ;;  %p1216_p5 = scmp.lt.s32.totalorder %s1214_s28, %s1207_s30 }
  0x5a   : > { %p1211_p0 = pneg %p1210_p4  ;;  %p1217_p11 = por %p1216_p5, %p1215_p2 }
  0x5c   : > { %p1218_p12 = pnand %p1217_p11, %p1211_p0 }
  0x5e   : > { %1221 = shalt.err (!%p1218_p12)
}
  0x5f   : > { %1086 = dma.hbm_to_vmem [thread:$0]  (!%p1644_p8), %s1462_s29, 1024, %s1464_s22, %s1466_s11, %s1300_s19, %s1300_s19, %s1301_s20  }
  0x60   : > { %p1645_p3 = scmp.ne.s32.totalorder %s1639_s26, 0 }
  0x61   : > { %p1646_p6 = scmp.eq.s32.totalorder (!%p1645_p3), %s1347_s16, 0 }
  0x62   : > { %180 = sbr.rel (%p1645_p3) target bundleno = 854 (0x356), region = 32 }
  0x69   : > { %1267 = dma.done.wait (%p1646_p6), [#allocation3], 256   ;;  %p1647_p13 = pmov %p1646_p6 }
  0x6a   : > { %p1648_p7 = pmov %p1646_p6 }
  0x6b   : > { %1269 = vsyncadd (%p1647_p13), [#allocation3], 4294967040 }
  0x6c   : > { %1271 = dma.done.wait (%p1648_p7), [#allocation6], 256   ;;  %p1649_p9 = pmov %p1646_p6 }
  0x6d   : > { %s190_s5 = sand.u32 1, %s1347_s16   ;;  %s1509_s19 = sand.u32 1, %s1288_s13  }
  0x6e   : > { %1273 = vsyncadd (%p1649_p9), [#allocation6], 4294967040  ;;  %s946_s26 = sshll.u32 %s1509_s19, 6  ;;  %s191_s20 = scalar_lea.sflag [#allocation3], %s190_s5 }
  0x6f   : > { %s194_s29 = scalar_lea.vmem [#allocation7], %s946_s26  ;;  %p1650_p8 = scmp.ne.s32.totalorder %s1636_s23, 0 }
  0x71   : > { %1275 = dma.done.wait (%p1650_p8), %s191_s20, 1024  }
  0x72   : > { %1277 = vsyncadd (%p1650_p8), %s191_s20, 4294966272  ;;  %v219_v0 = vld [vmem:[%s194_s29] sm:$0xff]  ;;  %v221_v1 = vld [vmem:[%s194_s29 + $0x10] sm:$0xff]  ;;  %vm357_vm0 = vcmask 130048   ;;  %s947_s23 = sshll.u32 %s1509_s19, 7  ;;  %vm810_vm1 = vcmask 261120  }
  0x73   : > { %227 = vxpose.xlu0.b32.start [1/2] (short) (narrow) %v219_v0, 16  ;;  %259 = vxpose.xlu1.b32.start [1/2] (short) (narrow) %v221_v1, 16  ;;  %v220_v2 = vld [vmem:[%s194_s29 + $0x8] sm:$0xff]  ;;  %v222_v3 = vld [vmem:[%s194_s29 + $0x18] sm:$0xff]  ;;  %v355_v4 = vld [vmem:[#allocation2] sm:$0xff]  ;;  %s1541_s22 = scalar_lea.vmem [#allocation8], %s947_s23 }
  0x74   : > { %v356_v5 = vld [vmem:[#allocation2 + $0x8] sm:$0xff]  ;;  %v223_v7 = vld [vmem:[%s194_s29 + $0x20] sm:$0xff]  ;;  %v225_v8 = vld [vmem:[%s194_s29 + $0x30] sm:$0xff]  ;;  %s981_s11 = sshll.u32 %s1347_s16, 11  ;;  %s842_s4 = sshll.u32 %s1541_s22, 4  ;;  %s1578_s4 = int_to_ptr.vmem [resolvable:$true] %s842_s4 }
  0x75   : > { %v1054_v6 = vpack.c.bf16 %v356_v5, %v355_v4  ;;  %v224_v9 = vld [vmem:[%s194_s29 + $0x28] sm:$0xff]  ;;  %v226_v10 = vld [vmem:[%s194_s29 + $0x38] sm:$0xff]  ;;  %v615_v23 = vld [vmem:[#allocation5] sm:$0xff]  ;;  %s1576_s6 = scalar_lea.hbm %s1629_s3, %s981_s11  ;;  %s828_s16 = scalar_lea.sflag [#allocation4], %s1509_s19 }
  0x76   : > { %v616_v24 = vld [vmem:[#allocation5 + $0x8] sm:$0xff]  ;;  %s1222_s8 = scalar_lea.vmem %s1578_s4, 2048  ;;  %p1651_p1 = scmp.ne.s32.totalorder %s1637_s24, 0 }
  0x77   : > { %228 = vxpose.xlu0.b32.end [2/2] (short) (narrow) %v220_v2, 16  ;;  %260 = vxpose.xlu1.b32.end [2/2] (short) (narrow) %v222_v3, 16  ;;  %v1058_v25 = vpack.c.bf16 %v616_v24, %v615_v23  ;;  %p1223_p10 = scmp.ne.s32.totalorder %s1578_s4, %s1222_s8  ;;  %s1303_s9 = smov [#allocation8]  }
  0x78   : > { %1055 = vmatprep.subr.bf16.mxu0 %v1054_v6  ;;  %s1226_s30 = sshll.u32 %s1303_s9, 4  ;;  %s1227_s30 = int_to_ptr.vmem [resolvable:$false] %s1226_s30 }
  0x79   : > { %1057 = vmatpush3.bf16.msra.mxu0 %v1054_v6  ;;  %1062 = vmatprep.subr.bf16.mxu1 %v1058_v25  ;;  %p1224_p4 = pnand %p1223_p10, %p1651_p1  ;;  %s1228_s7 = scalar_lea.vmem %s1227_s30, 4096 }
  0x7a   : > { %1059 = vmatprep.subr.bf16.mxu0 %v1058_v25  ;;  %1063 = vmatpush3.bf16.msra.mxu1 %v1058_v25  ;;  %p1229_p2 = scmp.lt.s32.totalorder %s1578_s4, %s1227_s30  ;;  %p1230_p5 = scmp.lt.s32.totalorder %s1228_s7, %s1222_s8 }
  0x7b   : > { %291 = vxpose.xlu0.b32.start [1/2] (short) (narrow) %v223_v7, 16  ;;  %323 = vxpose.xlu1.b32.start [1/2] (short) (narrow) %v225_v8, 16  ;;  %p1225_p0 = pneg %p1224_p4 }
  0x7c   : > { %p1231_p11 = por %p1230_p5, %p1229_p2 }
  0x7e   : > { %p1232_p12 = pnand %p1231_p11, %p1225_p0 }
  0x7f   : > { %292 = vxpose.xlu0.b32.end [2/2] (short) (narrow) %v224_v9, 16  ;;  %324 = vxpose.xlu1.b32.end [2/2] (short) (narrow) %v226_v10, 16 }
  0xf3   : > { %v243_v11 = vpop.trf.xlu0  ;;  %v275_v12 = vpop.trf.xlu1 }
  0xf4   : > { %1014 = vmatprep.mubr.msk.f32.mxu0 %vm357_vm0, %v243_v11 }
  0xf7   : > { %v244_v13 = vpop.trf.xlu0  ;;  %v276_v14 = vpop.trf.xlu1 }
  0xf8   : > { %1015 = vmatmul.mubr.msk.f32.vlgmr.msra.gmra.mrb[0].mxu0 %vm357_vm0, %v244_v13 }
  0xf9   : > { %1017 = vmatprep.mubr.msk.f32.mxu0 %vm357_vm0, %v275_v12  ;;  %1061 = vmatpush3.bf16.msra.mxu0 %v1058_v25 }
  0xfb   : > { %v307_v15 = vpop.trf.xlu0  ;;  %v339_v16 = vpop.trf.xlu1 }
  0xfc   : > { %1018 = vmatmul.mubr.msk.f32.gmra.mrb[2].mxu0 %vm357_vm0, %v276_v14 }
  0xfd   : > { %1020 = vmatprep.mubr.msk.f32.mxu0 %vm357_vm0, %v307_v15 }
  0xff   : > { %v308_v17 = vpop.trf.xlu0  ;;  %v340_v18 = vpop.trf.xlu1 }
 0x100   : > { %1021 = vmatmul.mubr.msk.f32.gmra.mrb[4].mxu0 %vm357_vm0, %v308_v17 }
 0x101   : > { %1023 = vmatprep.mubr.msk.f32.mxu0 %vm357_vm0, %v339_v16 }
 0x104   : > { %1024 = vmatmul.mubr.msk.f32.gmra.mrb[6].mxu0 %vm357_vm0, %v340_v18 }
 0x1cb   : > { %v1016_v19 = vpop.f32.mrb[0].mxu0 }
 0x1cc   : > { %v448_v20 = vpop.f32.mrb[1].mxu0 }
 0x1cf   : > { %v1019_v21 = vpop.f32.mrb[2].mxu0 }
 0x1d0   : > { %v458_v22 = vpop.f32.mrb[3].mxu0 }
 0x1d1   : > { %519 = vxpose.xlu0.b32.start [1/2] (short) (narrow) %v458_v22, 32 }
 0x1d3   : > { %v1022_v26 = vpop.f32.mrb[4].mxu0 }
 0x1d4   : > { %v468_v27 = vpop.f32.mrb[5].mxu0 }
 0x1d5   : > { %520 = vxpose.xlu0.b32.end [2/2] (short) (narrow) %v1019_v21, 32  ;;  %551 = vxpose.xlu1.b32.start [1/2] (short) (narrow) %v468_v27, 32 }
 0x1d7   : > { %v1025_v28 = vpop.f32.mrb[6].mxu0 }
 0x1d8   : > { %v478_v29 = vpop.f32.mrb[7].mxu0 }
 0x1d9   : > { %552 = vxpose.xlu1.b32.end [2/2] (short) (narrow) %v1022_v26, 32 }
 0x1de   : > { %487 = vxpose.xlu0.b32.start [1/2] (short) (narrow) %v448_v20, 32 }
 0x1e2   : > { %488 = vxpose.xlu0.b32.end [2/2] (short) (narrow) %v1016_v19, 32  ;;  %583 = vxpose.xlu1.b32.start [1/2] (short) (narrow) %v478_v29, 32 }
 0x1e6   : > { %584 = vxpose.xlu1.b32.end [2/2] (short) (narrow) %v1025_v28, 32 }
 0x251   : > { %v535_v30 = vpop.trf.xlu0 }
 0x252   : > { %1036 = vmatprep.mubr.msk.f32.mxu1 %vm357_vm0, %v535_v30 }
 0x255   : > { %v567_v31 = vpop.trf.xlu1  ;;  %v536_v32 = vpop.trf.xlu0 }
 0x256   : > { %1037 = vmatmul.mubr.msk.f32.vlgmr.msra.gmra.mrb[0].mxu1 %vm357_vm0, %v536_v32 }
 0x259   : > { %v568_v33 = vpop.trf.xlu1  ;;  %v537_v34 = vpop.trf.xlu0 }
 0x25a   : > { %1039 = vmatprep.mubr.msk.f32.mxu1 %vm357_vm0, %v537_v34 }
 0x25d   : > { %v569_v35 = vpop.trf.xlu1  ;;  %v538_v36 = vpop.trf.xlu0 }
 0x25e   : > { %1040 = vmatmul.mubr.msk.f32.gmra.mrb[2].mxu1 %vm357_vm0, %v538_v36 }
 0x25f   : > { %1042 = vmatprep.mubr.msk.f32.mxu1 %vm357_vm0, %v567_v31 }
 0x261   : > { %v570_v37 = vpop.trf.xlu1  ;;  %v503_v38 = vpop.trf.xlu0 }
 0x262   : > { %1043 = vmatmul.mubr.msk.f32.gmra.mrb[4].mxu1 %vm357_vm0, %v568_v33  ;;  %1030 = vmatprep.mubr.msk.f32.mxu0 %vm357_vm0, %v503_v38 }
 0x263   : > { %1045 = vmatprep.mubr.msk.f32.mxu1 %vm357_vm0, %v569_v35 }
 0x265   : > { %v599_v39 = vpop.trf.xlu1  ;;  %v504_v40 = vpop.trf.xlu0 }
 0x266   : > { %1046 = vmatmul.mubr.msk.f32.gmra.mrb[6].mxu1 %vm357_vm0, %v570_v37  ;;  %1031 = vmatmul.mubr.msk.f32.vlgmr.msra.gmra.mrb[8].mxu0 %vm357_vm0, %v504_v40 }
 0x267   : > { %1048 = vmatprep.mubr.msk.f32.mxu1 %vm357_vm0, %v599_v39 }
 0x269   : > { %v600_v41 = vpop.trf.xlu1  ;;  %v505_v42 = vpop.trf.xlu0 }
 0x26a   : > { %1049 = vmatmul.mubr.msk.f32.gmra.mrb[8].mxu1 %vm357_vm0, %v600_v41  ;;  %1033 = vmatprep.mubr.msk.f32.mxu0 %vm357_vm0, %v505_v42 }
 0x26d   : > { %v601_v43 = vpop.trf.xlu1  ;;  %v506_v44 = vpop.trf.xlu0 }
 0x26e   : > { %1051 = vmatprep.mubr.msk.f32.mxu1 %vm357_vm0, %v601_v43  ;;  %1034 = vmatmul.mubr.msk.f32.gmra.mrb[10].mxu0 %vm357_vm0, %v506_v44 }
 0x271   : > { %v602_v45 = vpop.trf.xlu1 }
 0x272   : > { %1052 = vmatmul.mubr.msk.f32.gmra.mrb[10].mxu1 %vm357_vm0, %v602_v45 }
 0x329   : > { %v1038_v46 = vpop.f32.mrb[0].mxu1 }
 0x32a   : > { %816 = vst.msk [vmem:[%s1541_s22 + $0x28] sm:$0xff] %vm810_vm1, %v1038_v46  ;;  %v751_v47 = vpop.f32.mrb[1].mxu1 }
 0x32b   : > { %815 = vst.msk [vmem:[%s1541_s22 + $0x20] sm:$0xff] %vm810_vm1, %v751_v47 }
 0x331   : > { %v1041_v48 = vpop.f32.mrb[2].mxu1 }
 0x332   : > { %818 = vst.msk [vmem:[%s1541_s22 + $0x38] sm:$0xff] %vm810_vm1, %v1041_v48  ;;  %v761_v49 = vpop.f32.mrb[3].mxu1 }
 0x333   : > { %817 = vst.msk [vmem:[%s1541_s22 + $0x30] sm:$0xff] %vm810_vm1, %v761_v49 }
 0x335   : > { %v1044_v50 = vpop.f32.mrb[4].mxu1 }
 0x336   : > { %820 = vst.msk [vmem:[%s1541_s22 + $0x48] sm:$0xff] %vm810_vm1, %v1044_v50  ;;  %v771_v51 = vpop.f32.mrb[5].mxu1 }
 0x337   : > { %819 = vst.msk [vmem:[%s1541_s22 + $0x40] sm:$0xff] %vm810_vm1, %v771_v51 }
 0x339   : > { %v1047_v52 = vpop.f32.mrb[6].mxu1  ;;  %v1032_v53 = vpop.f32.mrb[8].mxu0 }
 0x33a   : > { %822 = vst.msk [vmem:[%s1541_s22 + $0x58] sm:$0xff] %vm810_vm1, %v1047_v52  ;;  %v781_v54 = vpop.f32.mrb[7].mxu1  ;;  %812 = vst.msk [vmem:[%s1541_s22 + $0x8] sm:$0xff] %vm810_vm1, %v1032_v53  ;;  %v731_v55 = vpop.f32.mrb[9].mxu0 }
 0x33b   : > { %821 = vst.msk [vmem:[%s1541_s22 + $0x50] sm:$0xff] %vm810_vm1, %v781_v54  ;;  %811 = vst.msk [vmem:[%s1541_s22] sm:$0xff] %vm810_vm1, %v731_v55 }
 0x33d   : > { %v1050_v56 = vpop.f32.mrb[8].mxu1 }
 0x33e   : > { %824 = vst.msk [vmem:[%s1541_s22 + $0x68] sm:$0xff] %vm810_vm1, %v1050_v56  ;;  %v791_v57 = vpop.f32.mrb[9].mxu1 }
 0x33f   : > { %823 = vst.msk [vmem:[%s1541_s22 + $0x60] sm:$0xff] %vm810_vm1, %v791_v57 }
 0x341   : > { %v1035_v58 = vpop.f32.mrb[10].mxu0 }
 0x342   : > { %814 = vst.msk [vmem:[%s1541_s22 + $0x18] sm:$0xff] %vm810_vm1, %v1035_v58  ;;  %v741_v59 = vpop.f32.mrb[11].mxu0 }
 0x343   : > { %813 = vst.msk [vmem:[%s1541_s22 + $0x10] sm:$0xff] %vm810_vm1, %v741_v59 }
 0x345   : > { %v1053_v60 = vpop.f32.mrb[10].mxu1 }
 0x346   : > { %826 = vst.msk [vmem:[%s1541_s22 + $0x78] sm:$0xff] %vm810_vm1, %v1053_v60  ;;  %v801_v61 = vpop.f32.mrb[11].mxu1 }
 0x347   : > { %825 = vst.msk [vmem:[%s1541_s22 + $0x70] sm:$0xff] %vm810_vm1, %v801_v61 }
 0x348   : > { %1235 = shalt.err (!%p1232_p12)
}
 0x349   : > { %s1236_s10 = scalar_lea.hbm %s1576_s6, 2048  ;;  %s1240_s26 = scalar_lea.hbm %s1629_s3, 4096 }
 0x34a   : > { %p1237_p3 = scmp.ne.s32.totalorder %s1576_s6, %s1236_s10  ;;  %p1241_p7 = scmp.lt.u32.totalorder %s1576_s6, %s1629_s3 }
 0x34b   : > { %p1242_p9 = scmp.lt.u32.totalorder %s1240_s26, %s1236_s10  ;;  %p1244_p10 = scmp.lt.u32.totalorder %s1236_s10, %s1576_s6 }
 0x34c   : > { %p1238_p6 = pnand %p1237_p3, %p1651_p1 }
 0x34d   : > { %p1243_p8 = por %p1242_p9, %p1241_p7 }
 0x34e   : > { %p1239_p13 = pneg %p1238_p6 }
 0x34f   : > { %p1245_p4 = por %p1244_p10, %p1243_p8 }
 0x351   : > { %p1246_p0 = pnand %p1245_p4, %p1239_p13 }
 0x353   : > { %1249 = shalt.err (!%p1246_p0)
}
 0x354   : > { %s1304_s23 = smov 128   ;;  %s1305_s22 = smov 8  }
 0x355   : > { %1074 = dma.vmem_to_hbm [thread:$0]  (%p1651_p1), %s1578_s4, 2048, %s1576_s6, %s828_s16, %s1304_s23, %s1304_s23, %s1305_s22  }
 0x356 PF: > { %s857_s11 = sand.u32 1, %s1284_s12   ;;  %p1652_p2 = scmp.ne.s32.totalorder %s1638_s25, 0 }
 0x357   : > { %p1653_p5 = scmp.ge.s32.totalorder %s1296_s15, 2  ;;  %s858_s17 = scalar_lea.sflag [#allocation4], %s857_s11 }
 0x359   : > { %p1088_p11 = pnand %p1653_p5, %p1652_p2 }
 0x35b   : > { %1279 = dma.done.wait (!%p1088_p11), %s858_s17, 2048  }
 0x35c   : > { %1281 = vsyncadd (!%p1088_p11), %s858_s17, 4294965248  ;;  %p15_p12 = scmp.ge.s32.totalorder %s1351_s18, 4   ;;  %s1654_s12 = smov %s1288_s13 }
 0x35d   : > { %s1655_s13 = smov %s1292_s14  ;;  %s1656_s14 = smov %s1363_s21 }
 0x35e   : > { %s1657_s15 = smov %s1351_s18  ;;  %17 = sbr.rel (!%p15_p12) target bundleno = 5 (0x5), region = 84 }
 0x365   :  { %863 = vsyncpa [#allocation3], 1 }
 0x366   :  { %865 = vsyncpa [#allocation3 + $0x1], 1 }
 0x367   :  { %866 = vsyncpa [#allocation6], 1 }
 0x368   :  { %867 = vsyncpa [#allocation4], 1 }
 0x369   :  { %869 = vsyncpa [#allocation4 + $0x1], 1 }

</bundles_post_ra>
